<compile_context>
chip_gen: v7x
topology: tpu7x:2x2x1
jax: 0.10.0
libtpu: 0.0.40
codegen_flags: <defaults>
</compile_context>

<pallas_src>
import jax
import jax.numpy as jnp
from jax.experimental import pallas as pl
from jax.experimental.pallas import tpu as pltpu

N_EMB = 64
CONTEXT_LENGTH = 8
N_HEADS = 8
HEAD_SIZE = N_EMB // N_HEADS
LN_EPS = 1e-5

MM_DTYPE = jnp.bfloat16  # MXU-native matmul input dtype (f32 accumulation)


def _layer_norm(x, gamma, beta):
    mu = jnp.mean(x, axis=-1, keepdims=True)
    var = jnp.mean((x - mu) ** 2, axis=-1, keepdims=True)
    return (x - mu) * jax.lax.rsqrt(var + LN_EPS) * gamma + beta


def block_kernel(x_ref,
                 g1_ref, be1_ref,
                 wq_ref, wk_ref, wv_ref,
                 wp_ref, bp_ref,
                 g2_ref, be2_ref,
                 w1_ref, bf1_ref,
                 w2_ref, bf2_ref,
                 mkv_ref, msum_ref,
                 o_ref):
    R, C = x_ref.shape                  # R = seqs_per_block * T residual rows
    T = CONTEXT_LENGTH
    bt = R // T

    x = x_ref[...]                                         # (R, C) f32

    # ---- LN1 (f32) ----
    h1 = _layer_norm(x, g1_ref[...], be1_ref[...])

    # ---- QKV projections: bf16 operands, f32 accumulation ----
    h1m = h1.astype(MM_DTYPE)
    q = jnp.dot(h1m, wq_ref[...], preferred_element_type=jnp.float32)   # (R, C)
    k = jnp.dot(h1m, wk_ref[...], preferred_element_type=jnp.float32)
    v = jnp.dot(h1m, wv_ref[...], preferred_element_type=jnp.float32)

    # ---- All heads at once (no per-head loop / lane slicing / concat) ----
    # Scores live in the lane axis as m = h*T + j:
    #   s[b, i, m] = sum_d q_h[b, i, d] * k_h[b, j, d]   with h = m // T, j = m % T
    # Build Kt[b, m, c] = k[b, m % T, c] * (m // T == c // HEAD_SIZE) by stacking
    # N_HEADS copies of k along the row axis and masking, so one batched matmul
    # covers every head (same construction for V).
    q3 = q.reshape(bt, T, C).astype(MM_DTYPE)
    k3 = k.reshape(bt, T, C)
    v3 = v.reshape(bt, T, C)
    mkv = mkv_ref[...]                                     # (H*T, C) 0/1 mask
    kt = (jnp.concatenate([k3] * N_HEADS, axis=1) * mkv).astype(MM_DTYPE)
    vt = (jnp.concatenate([v3] * N_HEADS, axis=1) * mkv).astype(MM_DTYPE)

    s = jnp.einsum("bic,bmc->bim", q3, kt,
                   preferred_element_type=jnp.float32)     # (bt, T, H*T)
    s2 = s.reshape(R, N_HEADS * T)
    # Per-head softmax over groups of T lanes (unscaled & unmasked, matching the
    # reference where tril == ones).  Subtracting the global row max is exact
    # because it is constant within each head's lane group.
    s2 = s2 - jnp.max(s2, axis=-1, keepdims=True)
    e = jnp.exp(s2)
    # Per-head denominators, broadcast back to every lane of the head via a
    # block-diagonal 0/1 matmul; EUP approx reciprocal replaces the divide.
    denom = jnp.dot(e, msum_ref[...], preferred_element_type=jnp.float32)
    p = e * pl.reciprocal(denom, approx=True)
    p3 = p.reshape(bt, T, N_HEADS * T).astype(MM_DTYPE)

    ctx = jnp.einsum("bim,bmc->bic", p3, vt,
                     preferred_element_type=jnp.float32)   # (bt, T, C), heads concatenated
    attn = ctx.reshape(R, C)

    attn = jnp.dot(attn.astype(MM_DTYPE), wp_ref[...],
                   preferred_element_type=jnp.float32) + bp_ref[...]
    # TODO(synk): nn.Dropout(0.2) training-mode mask not implemented (identity).
    x2 = x + attn

    # ---- LN2 + FeedForward (Linear -> ReLU -> Linear) ----
    h2 = _layer_norm(x2, g2_ref[...], be2_ref[...])
    ff = jnp.dot(h2.astype(MM_DTYPE), w1_ref[...],
                 preferred_element_type=jnp.float32) + bf1_ref[...]
    ff = jnp.maximum(ff, 0.0)
    ff = jnp.dot(ff.astype(MM_DTYPE), w2_ref[...],
                 preferred_element_type=jnp.float32) + bf2_ref[...]

    o_ref[...] = x2 + ff


def _seqs_per_block(batch, max_seqs=32):
    # Tiny batches: one grid step (no per-step pipeline overhead).
    # Larger batches: >=2 balanced steps (v7x has 2 TensorCores) while keeping
    # ~256 residual rows per step so DMAs/stores are large.
    if batch <= 16:
        return batch
    n_steps = max(2, -(-batch // max_seqs))
    return -(-batch // n_steps)


def block_forward(x, params, max_seqs_per_block=32):
    B, T, C = x.shape
    assert T == CONTEXT_LENGTH and C == N_EMB

    bt = _seqs_per_block(B, max_seqs_per_block)
    n_steps = -(-B // bt)
    Bp = n_steps * bt
    rows = bt * T                       # residual-stream rows per grid step

    # Fold (B, T) into one row axis so each grid step works on a big (rows, C)
    # slab; pad the batch (with zeros) to a multiple of the tile if needed.
    x2d = x.reshape(B * T, C)
    if Bp != B:
        x2d = jnp.pad(x2d, ((0, (Bp - B) * T), (0, 0)))

    # Matmul weights in bf16 (MXU-native, halves weight DMA); LN/bias in f32.
    wq = params["wq"].astype(MM_DTYPE)
    wk = params["wk"].astype(MM_DTYPE)
    wv = params["wv"].astype(MM_DTYPE)
    wp = params["wp"].astype(MM_DTYPE)
    w1 = params["w1"].astype(MM_DTYPE)
    w2 = params["w2"].astype(MM_DTYPE)

    # Head block-structure masks (constants), see block_kernel.
    m_idx = jnp.arange(N_HEADS * CONTEXT_LENGTH)
    c_idx = jnp.arange(N_EMB)
    mask_kv = (m_idx[:, None] // CONTEXT_LENGTH
               == c_idx[None, :] // HEAD_SIZE).astype(jnp.float32)
    mask_sum = (m_idx[:, None] // CONTEXT_LENGTH
                == m_idx[None, :] // CONTEXT_LENGTH).astype(jnp.float32)

    operands = [x2d,
                params["g1"], params["be1"],
                wq, wk, wv,
                wp, params["bp"],
                params["g2"], params["be2"],
                w1, params["bf1"],
                w2, params["bf2"],
                mask_kv, mask_sum]

    def full_spec(arr):
        nd = arr.ndim
        return pl.BlockSpec(arr.shape, lambda i, _nd=nd: (0,) * _nd)

    in_specs = ([pl.BlockSpec((rows, C), lambda i: (i, 0))]
                + [full_spec(a) for a in operands[1:]])

    out2d = pl.pallas_call(
        block_kernel,
        out_shape=jax.ShapeDtypeStruct((Bp * T, C), jnp.float32),
        grid_spec=pltpu.PrefetchScalarGridSpec(
            num_scalar_prefetch=0,
            grid=(n_steps,),
            in_specs=in_specs,
            out_specs=pl.BlockSpec((rows, C), lambda i: (i, 0)),
        ),
        compiler_params=pltpu.CompilerParams(
            dimension_semantics=("parallel",)),
    )(*operands)

    return out2d[:B * T].reshape(B, T, C)


def make_params(key):
    """Deterministic synthetic parameters (shapes follow the PyTorch module)."""
    ks = jax.random.split(key, 8)
    scale = 0.1

    def lin(k, fan_in, fan_out):
        return scale * jax.random.normal(k, (fan_in, fan_out), jnp.float32)

    return {
        # LayerNorm defaults: gamma=1, beta=0
        "g1": jnp.ones((1, N_EMB), jnp.float32),
        "be1": jnp.zeros((1, N_EMB), jnp.float32),
        # per-head q/k/v Linear(n_emb, head_size, bias=False), packed per-head
        # along the output dim -> (n_emb, n_heads*head_size) = (64, 64)
        "wq": lin(ks[0], N_EMB, N_EMB),
        "wk": lin(ks[1], N_EMB, N_EMB),
        "wv": lin(ks[2], N_EMB, N_EMB),
        # proj: Linear(n_emb, n_emb)
        "wp": lin(ks[3], N_EMB, N_EMB),
        "bp": scale * jax.random.normal(ks[4], (1, N_EMB), jnp.float32),
        "g2": jnp.ones((1, N_EMB), jnp.float32),
        "be2": jnp.zeros((1, N_EMB), jnp.float32),
        # FeedForward: Linear(64, 256) -> ReLU -> Linear(256, 64)
        "w1": lin(ks[5], N_EMB, 4 * N_EMB),
        "bf1": jnp.zeros((1, 4 * N_EMB), jnp.float32),
        "w2": lin(ks[6], 4 * N_EMB, N_EMB),
        "bf2": scale * jax.random.normal(ks[7], (1, N_EMB), jnp.float32),
    }


def block_reference(x, p, matmul_dtype=jnp.float32):
    """Pure-JAX reference.  matmul_dtype=bf16 mirrors the kernel's casting."""
    md = matmul_dtype

    def mm(a, w):
        return jnp.dot(a.astype(md), w.astype(md),
                       preferred_element_type=jnp.float32)

    h1 = _layer_norm(x, p["g1"], p["be1"])
    q = mm(h1, p["wq"])
    k = mm(h1, p["wk"])
    v = mm(h1, p["wv"])
    B, T, C = x.shape
    q4 = q.reshape(B, T, N_HEADS, HEAD_SIZE)
    k4 = k.reshape(B, T, N_HEADS, HEAD_SIZE)
    v4 = v.reshape(B, T, N_HEADS, HEAD_SIZE)
    s = jnp.einsum("bqhd,bkhd->bhqk", q4.astype(md), k4.astype(md),
                   preferred_element_type=jnp.float32)
    pr = jax.nn.softmax(s, axis=-1)
    o = jnp.einsum("bhqk,bkhd->bqhd", pr.astype(md), v4.astype(md),
                   preferred_element_type=jnp.float32)
    attn = mm(o.reshape(B, T, C), p["wp"]) + p["bp"]
    x2 = x + attn
    h2 = _layer_norm(x2, p["g2"], p["be2"])
    ff = jnp.maximum(mm(h2, p["w1"]) + p["bf1"], 0.0)
    ff = mm(ff, p["w2"]) + p["bf2"]
    return x2 + ff


if __name__ == "__main__":
    key = jax.random.PRNGKey(0)
    k_x, k_p = jax.random.split(key)

    B = 2
    x = jax.random.normal(k_x, (B, CONTEXT_LENGTH, N_EMB), jnp.float32)
    params = make_params(k_p)

    out = jax.block_until_ready(block_forward(x, params))
    assert out.shape == (B, CONTEXT_LENGTH, N_EMB)

    ref_matched = block_reference(x, params, matmul_dtype=MM_DTYPE)
    ref_f32 = block_reference(x, params, matmul_dtype=jnp.float32)
    assert jnp.allclose(out, ref_matched, rtol=1e-2, atol=1e-2), \
        "mismatch vs bf16-matched reference"
    assert jnp.allclose(out, ref_f32, rtol=5e-2, atol=5e-2), \
        "mismatch vs float32 reference"

    print("KERNEL_OK")
</pallas_src>

<mosaic_0001>
module attributes {stable_mosaic.version = 11 : i64} {
  func.func @block_kernel(%arg0: i32, %arg1: memref<16x64xf32, #tpu.memory_space<vmem>>, %arg2: memref<1x64xf32, #tpu.memory_space<vmem>>, %arg3: memref<1x64xf32, #tpu.memory_space<vmem>>, %arg4: memref<64x64xbf16, #tpu.memory_space<vmem>>, %arg5: memref<64x64xbf16, #tpu.memory_space<vmem>>, %arg6: memref<64x64xbf16, #tpu.memory_space<vmem>>, %arg7: memref<64x64xbf16, #tpu.memory_space<vmem>>, %arg8: memref<1x64xf32, #tpu.memory_space<vmem>>, %arg9: memref<1x64xf32, #tpu.memory_space<vmem>>, %arg10: memref<1x64xf32, #tpu.memory_space<vmem>>, %arg11: memref<64x256xbf16, #tpu.memory_space<vmem>>, %arg12: memref<1x256xf32, #tpu.memory_space<vmem>>, %arg13: memref<256x64xbf16, #tpu.memory_space<vmem>>, %arg14: memref<1x64xf32, #tpu.memory_space<vmem>>, %arg15: memref<64x64xf32, #tpu.memory_space<vmem>>, %arg16: memref<64x64xf32, #tpu.memory_space<vmem>>, %arg17: memref<16x64xf32, #tpu.memory_space<vmem>>) attributes {dimension_semantics = [#tpu.dimension_semantics<parallel>], iteration_bounds = array<i64: 1>, scalar_prefetch = 0 : i64, scratch_operands = 0 : i64, tpu.core_type = #tpu.core_type<tc>, window_params = [{transform_indices = @transform_0, window_bounds = array<i64: 16, 64>}, {pipeline_mode = #tpu.pipeline_mode<synchronous>, transform_indices = @transform_1, window_bounds = array<i64: 1, 64>}, {pipeline_mode = #tpu.pipeline_mode<synchronous>, transform_indices = @transform_2, window_bounds = array<i64: 1, 64>}, {pipeline_mode = #tpu.pipeline_mode<synchronous>, transform_indices = @transform_3, window_bounds = array<i64: 64, 64>}, {pipeline_mode = #tpu.pipeline_mode<synchronous>, transform_indices = @transform_4, window_bounds = array<i64: 64, 64>}, {pipeline_mode = #tpu.pipeline_mode<synchronous>, transform_indices = @transform_5, window_bounds = array<i64: 64, 64>}, {pipeline_mode = #tpu.pipeline_mode<synchronous>, transform_indices = @transform_6, window_bounds = array<i64: 64, 64>}, {pipeline_mode = #tpu.pipeline_mode<synchronous>, transform_indices = @transform_7, window_bounds = array<i64: 1, 64>}, {pipeline_mode = #tpu.pipeline_mode<synchronous>, transform_indices = @transform_8, window_bounds = array<i64: 1, 64>}, {pipeline_mode = #tpu.pipeline_mode<synchronous>, transform_indices = @transform_9, window_bounds = array<i64: 1, 64>}, {pipeline_mode = #tpu.pipeline_mode<synchronous>, transform_indices = @transform_10, window_bounds = array<i64: 64, 256>}, {pipeline_mode = #tpu.pipeline_mode<synchronous>, transform_indices = @transform_11, window_bounds = array<i64: 1, 256>}, {pipeline_mode = #tpu.pipeline_mode<synchronous>, transform_indices = @transform_12, window_bounds = array<i64: 256, 64>}, {pipeline_mode = #tpu.pipeline_mode<synchronous>, transform_indices = @transform_13, window_bounds = array<i64: 1, 64>}, {pipeline_mode = #tpu.pipeline_mode<synchronous>, transform_indices = @transform_14, window_bounds = array<i64: 64, 64>}, {pipeline_mode = #tpu.pipeline_mode<synchronous>, transform_indices = @transform_15, window_bounds = array<i64: 64, 64>}, {transform_indices = @transform_16, window_bounds = array<i64: 16, 64>}]} {
    %c0 = arith.constant 0 : index
    %c0_0 = arith.constant 0 : index
    %0 = vector.load %arg1[%c0, %c0_0] : memref<16x64xf32, #tpu.memory_space<vmem>>, vector<16x64xf32>
    %c0_1 = arith.constant 0 : index
    %c0_2 = arith.constant 0 : index
    %1 = vector.load %arg2[%c0_1, %c0_2] : memref<1x64xf32, #tpu.memory_space<vmem>>, vector<1x64xf32>
    %c0_3 = arith.constant 0 : index
    %c0_4 = arith.constant 0 : index
    %2 = vector.load %arg3[%c0_3, %c0_4] : memref<1x64xf32, #tpu.memory_space<vmem>>, vector<1x64xf32>
    %cst = arith.constant dense<0.000000e+00> : vector<16xf32>
    %3 = vector.multi_reduction <add>, %0, %cst [1] : vector<16x64xf32> to vector<16xf32>
    %4 = vector.shape_cast %3 : vector<16xf32> to vector<16x1xf32>
    %cst_5 = arith.constant 6.400000e+01 : f32
    %5 = vector.broadcast %cst_5 : f32 to vector<16x1xf32>
    %6 = arith.divf %4, %5 : vector<16x1xf32>
    %7 = vector.broadcast %6 : vector<16x1xf32> to vector<16x64xf32>
    %8 = arith.subf %0, %7 : vector<16x64xf32>
    %9 = arith.mulf %8, %8 : vector<16x64xf32>
    %cst_6 = arith.constant dense<0.000000e+00> : vector<16xf32>
    %10 = vector.multi_reduction <add>, %9, %cst_6 [1] : vector<16x64xf32> to vector<16xf32>
    %11 = vector.shape_cast %10 : vector<16xf32> to vector<16x1xf32>
    %cst_7 = arith.constant 6.400000e+01 : f32
    %12 = vector.broadcast %cst_7 : f32 to vector<16x1xf32>
    %13 = arith.divf %11, %12 : vector<16x1xf32>
    %14 = vector.broadcast %6 : vector<16x1xf32> to vector<16x64xf32>
    %15 = arith.subf %0, %14 : vector<16x64xf32>
    %cst_8 = arith.constant 9.99999974E-6 : f32
    %16 = vector.broadcast %cst_8 : f32 to vector<16x1xf32>
    %17 = arith.addf %13, %16 : vector<16x1xf32>
    %18 = math.rsqrt %17 : vector<16x1xf32>
    %19 = vector.broadcast %18 : vector<16x1xf32> to vector<16x64xf32>
    %20 = arith.mulf %15, %19 : vector<16x64xf32>
    %21 = vector.broadcast %1 : vector<1x64xf32> to vector<16x64xf32>
    %22 = arith.mulf %20, %21 : vector<16x64xf32>
    %23 = vector.broadcast %2 : vector<1x64xf32> to vector<16x64xf32>
    %24 = arith.addf %22, %23 : vector<16x64xf32>
    %25 = arith.truncf %24 : vector<16x64xf32> to vector<16x64xbf16>
    %c0_9 = arith.constant 0 : index
    %c0_10 = arith.constant 0 : index
    %26 = vector.load %arg4[%c0_9, %c0_10] : memref<64x64xbf16, #tpu.memory_space<vmem>>, vector<64x64xbf16>
    %cst_11 = arith.constant dense<0.000000e+00> : vector<16x64xf32>
    %27 = tpu.matmul %25, %26, %cst_11 {dimension_numbers = #tpu.dot_dimension_numbers<[1], [0], [0], [1], [0, 0, 1, 1], [], []>} : vector<16x64xbf16>, vector<64x64xbf16>, vector<16x64xf32> -> vector<16x64xf32>
    %c0_12 = arith.constant 0 : index
    %c0_13 = arith.constant 0 : index
    %28 = vector.load %arg5[%c0_12, %c0_13] : memref<64x64xbf16, #tpu.memory_space<vmem>>, vector<64x64xbf16>
    %cst_14 = arith.constant dense<0.000000e+00> : vector<16x64xf32>
    %29 = tpu.matmul %25, %28, %cst_14 {dimension_numbers = #tpu.dot_dimension_numbers<[1], [0], [0], [1], [0, 0, 1, 1], [], []>} : vector<16x64xbf16>, vector<64x64xbf16>, vector<16x64xf32> -> vector<16x64xf32>
    %c0_15 = arith.constant 0 : index
    %c0_16 = arith.constant 0 : index
    %30 = vector.load %arg6[%c0_15, %c0_16] : memref<64x64xbf16, #tpu.memory_space<vmem>>, vector<64x64xbf16>
    %cst_17 = arith.constant dense<0.000000e+00> : vector<16x64xf32>
    %31 = tpu.matmul %25, %30, %cst_17 {dimension_numbers = #tpu.dot_dimension_numbers<[1], [0], [0], [1], [0, 0, 1, 1], [], []>} : vector<16x64xbf16>, vector<64x64xbf16>, vector<16x64xf32> -> vector<16x64xf32>
    %32 = vector.shape_cast %27 : vector<16x64xf32> to vector<2x8x64xf32>
    %33 = arith.truncf %32 : vector<2x8x64xf32> to vector<2x8x64xbf16>
    %34 = vector.shape_cast %29 : vector<16x64xf32> to vector<2x8x64xf32>
    %35 = vector.shape_cast %31 : vector<16x64xf32> to vector<2x8x64xf32>
    %c0_18 = arith.constant 0 : index
    %c0_19 = arith.constant 0 : index
    %36 = vector.load %arg15[%c0_18, %c0_19] : memref<64x64xf32, #tpu.memory_space<vmem>>, vector<64x64xf32>
    %37 = tpu.concatenate %34, %34, %34, %34, %34, %34, %34, %34 in 1 : vector<2x8x64xf32>, vector<2x8x64xf32>, vector<2x8x64xf32>, vector<2x8x64xf32>, vector<2x8x64xf32>, vector<2x8x64xf32>, vector<2x8x64xf32>, vector<2x8x64xf32> -> vector<2x64x64xf32>
    %38 = vector.shape_cast %36 : vector<64x64xf32> to vector<1x64x64xf32>
    %39 = vector.broadcast %38 : vector<1x64x64xf32> to vector<2x64x64xf32>
    %40 = arith.mulf %37, %39 : vector<2x64x64xf32>
    %41 = arith.truncf %40 : vector<2x64x64xf32> to vector<2x64x64xbf16>
    %42 = tpu.concatenate %35, %35, %35, %35, %35, %35, %35, %35 in 1 : vector<2x8x64xf32>, vector<2x8x64xf32>, vector<2x8x64xf32>, vector<2x8x64xf32>, vector<2x8x64xf32>, vector<2x8x64xf32>, vector<2x8x64xf32>, vector<2x8x64xf32> -> vector<2x64x64xf32>
    %43 = vector.shape_cast %36 : vector<64x64xf32> to vector<1x64x64xf32>
    %44 = vector.broadcast %43 : vector<1x64x64xf32> to vector<2x64x64xf32>
    %45 = arith.mulf %42, %44 : vector<2x64x64xf32>
    %46 = arith.truncf %45 : vector<2x64x64xf32> to vector<2x64x64xbf16>
    "tpu.trace_start"() <{level = 10 : i32, message = "bic,bmc->bim"}> : () -> ()
    %cst_20 = arith.constant dense<0.000000e+00> : vector<2x8x64xf32>
    %47 = tpu.matmul %33, %41, %cst_20 {dimension_numbers = #tpu.dot_dimension_numbers<[2], [2], [1], [1], [0, 0, 0, 1, 1, 1], [0], [0]>} : vector<2x8x64xbf16>, vector<2x64x64xbf16>, vector<2x8x64xf32> -> vector<2x8x64xf32>
    "tpu.trace_stop"() : () -> ()
    %48 = vector.shape_cast %47 : vector<2x8x64xf32> to vector<16x64xf32>
    %cst_21 = arith.constant dense<0xFF800000> : vector<16xf32>
    %49 = vector.multi_reduction <maximumf>, %48, %cst_21 [1] : vector<16x64xf32> to vector<16xf32>
    %50 = vector.shape_cast %49 : vector<16xf32> to vector<16x1xf32>
    %51 = vector.broadcast %50 : vector<16x1xf32> to vector<16x64xf32>
    %52 = arith.subf %48, %51 : vector<16x64xf32>
    %53 = math.exp %52 : vector<16x64xf32>
    %c0_22 = arith.constant 0 : index
    %c0_23 = arith.constant 0 : index
    %54 = vector.load %arg16[%c0_22, %c0_23] : memref<64x64xf32, #tpu.memory_space<vmem>>, vector<64x64xf32>
    %cst_24 = arith.constant dense<0.000000e+00> : vector<16x64xf32>
    %55 = tpu.matmul %53, %54, %cst_24 {dimension_numbers = #tpu.dot_dimension_numbers<[1], [0], [0], [1], [0, 0, 1, 1], [], []>} : vector<16x64xf32>, vector<64x64xf32>, vector<16x64xf32> -> vector<16x64xf32>
    %56 = tpu.reciprocal %55 {approx = true} : vector<16x64xf32> -> vector<16x64xf32>
    %57 = arith.mulf %53, %56 : vector<16x64xf32>
    %58 = vector.shape_cast %57 : vector<16x64xf32> to vector<2x8x64xf32>
    %59 = arith.truncf %58 : vector<2x8x64xf32> to vector<2x8x64xbf16>
    "tpu.trace_start"() <{level = 10 : i32, message = "bim,bmc->bic"}> : () -> ()
    %cst_25 = arith.constant dense<0.000000e+00> : vector<2x8x64xf32>
    %60 = tpu.matmul %59, %46, %cst_25 {dimension_numbers = #tpu.dot_dimension_numbers<[2], [1], [1], [2], [0, 0, 0, 1, 1, 2], [0], [0]>} : vector<2x8x64xbf16>, vector<2x64x64xbf16>, vector<2x8x64xf32> -> vector<2x8x64xf32>
    "tpu.trace_stop"() : () -> ()
    %61 = vector.shape_cast %60 : vector<2x8x64xf32> to vector<16x64xf32>
    %62 = arith.truncf %61 : vector<16x64xf32> to vector<16x64xbf16>
    %c0_26 = arith.constant 0 : index
    %c0_27 = arith.constant 0 : index
    %63 = vector.load %arg7[%c0_26, %c0_27] : memref<64x64xbf16, #tpu.memory_space<vmem>>, vector<64x64xbf16>
    %cst_28 = arith.constant dense<0.000000e+00> : vector<16x64xf32>
    %64 = tpu.matmul %62, %63, %cst_28 {dimension_numbers = #tpu.dot_dimension_numbers<[1], [0], [0], [1], [0, 0, 1, 1], [], []>} : vector<16x64xbf16>, vector<64x64xbf16>, vector<16x64xf32> -> vector<16x64xf32>
    %c0_29 = arith.constant 0 : index
    %c0_30 = arith.constant 0 : index
    %65 = vector.load %arg8[%c0_29, %c0_30] : memref<1x64xf32, #tpu.memory_space<vmem>>, vector<1x64xf32>
    %66 = vector.broadcast %65 : vector<1x64xf32> to vector<16x64xf32>
    %67 = arith.addf %64, %66 : vector<16x64xf32>
    %68 = arith.addf %0, %67 : vector<16x64xf32>
    %c0_31 = arith.constant 0 : index
    %c0_32 = arith.constant 0 : index
    %69 = vector.load %arg9[%c0_31, %c0_32] : memref<1x64xf32, #tpu.memory_space<vmem>>, vector<1x64xf32>
    %c0_33 = arith.constant 0 : index
    %c0_34 = arith.constant 0 : index
    %70 = vector.load %arg10[%c0_33, %c0_34] : memref<1x64xf32, #tpu.memory_space<vmem>>, vector<1x64xf32>
    %cst_35 = arith.constant dense<0.000000e+00> : vector<16xf32>
    %71 = vector.multi_reduction <add>, %68, %cst_35 [1] : vector<16x64xf32> to vector<16xf32>
    %72 = vector.shape_cast %71 : vector<16xf32> to vector<16x1xf32>
    %cst_36 = arith.constant 6.400000e+01 : f32
    %73 = vector.broadcast %cst_36 : f32 to vector<16x1xf32>
    %74 = arith.divf %72, %73 : vector<16x1xf32>
    %75 = vector.broadcast %74 : vector<16x1xf32> to vector<16x64xf32>
    %76 = arith.subf %68, %75 : vector<16x64xf32>
    %77 = arith.mulf %76, %76 : vector<16x64xf32>
    %cst_37 = arith.constant dense<0.000000e+00> : vector<16xf32>
    %78 = vector.multi_reduction <add>, %77, %cst_37 [1] : vector<16x64xf32> to vector<16xf32>
    %79 = vector.shape_cast %78 : vector<16xf32> to vector<16x1xf32>
    %cst_38 = arith.constant 6.400000e+01 : f32
    %80 = vector.broadcast %cst_38 : f32 to vector<16x1xf32>
    %81 = arith.divf %79, %80 : vector<16x1xf32>
    %82 = vector.broadcast %74 : vector<16x1xf32> to vector<16x64xf32>
    %83 = arith.subf %68, %82 : vector<16x64xf32>
    %cst_39 = arith.constant 9.99999974E-6 : f32
    %84 = vector.broadcast %cst_39 : f32 to vector<16x1xf32>
    %85 = arith.addf %81, %84 : vector<16x1xf32>
    %86 = math.rsqrt %85 : vector<16x1xf32>
    %87 = vector.broadcast %86 : vector<16x1xf32> to vector<16x64xf32>
    %88 = arith.mulf %83, %87 : vector<16x64xf32>
    %89 = vector.broadcast %69 : vector<1x64xf32> to vector<16x64xf32>
    %90 = arith.mulf %88, %89 : vector<16x64xf32>
    %91 = vector.broadcast %70 : vector<1x64xf32> to vector<16x64xf32>
    %92 = arith.addf %90, %91 : vector<16x64xf32>
    %93 = arith.truncf %92 : vector<16x64xf32> to vector<16x64xbf16>
    %c0_40 = arith.constant 0 : index
    %c0_41 = arith.constant 0 : index
    %94 = vector.load %arg11[%c0_40, %c0_41] : memref<64x256xbf16, #tpu.memory_space<vmem>>, vector<64x256xbf16>
    %cst_42 = arith.constant dense<0.000000e+00> : vector<16x256xf32>
    %95 = tpu.matmul %93, %94, %cst_42 {dimension_numbers = #tpu.dot_dimension_numbers<[1], [0], [0], [1], [0, 0, 1, 1], [], []>} : vector<16x64xbf16>, vector<64x256xbf16>, vector<16x256xf32> -> vector<16x256xf32>
    %c0_43 = arith.constant 0 : index
    %c0_44 = arith.constant 0 : index
    %96 = vector.load %arg12[%c0_43, %c0_44] : memref<1x256xf32, #tpu.memory_space<vmem>>, vector<1x256xf32>
    %97 = vector.broadcast %96 : vector<1x256xf32> to vector<16x256xf32>
    %98 = arith.addf %95, %97 : vector<16x256xf32>
    %cst_45 = arith.constant 0.000000e+00 : f32
    %99 = vector.broadcast %cst_45 : f32 to vector<16x256xf32>
    %100 = arith.maximumf %98, %99 : vector<16x256xf32>
    %101 = arith.truncf %100 : vector<16x256xf32> to vector<16x256xbf16>
    %c0_46 = arith.constant 0 : index
    %c0_47 = arith.constant 0 : index
    %102 = vector.load %arg13[%c0_46, %c0_47] : memref<256x64xbf16, #tpu.memory_space<vmem>>, vector<256x64xbf16>
    %cst_48 = arith.constant dense<0.000000e+00> : vector<16x64xf32>
    %103 = tpu.matmul %101, %102, %cst_48 {dimension_numbers = #tpu.dot_dimension_numbers<[1], [0], [0], [1], [0, 0, 1, 1], [], []>} : vector<16x256xbf16>, vector<256x64xbf16>, vector<16x64xf32> -> vector<16x64xf32>
    %c0_49 = arith.constant 0 : index
    %c0_50 = arith.constant 0 : index
    %104 = vector.load %arg14[%c0_49, %c0_50] : memref<1x64xf32, #tpu.memory_space<vmem>>, vector<1x64xf32>
    %105 = vector.broadcast %104 : vector<1x64xf32> to vector<16x64xf32>
    %106 = arith.addf %103, %105 : vector<16x64xf32>
    %107 = arith.addf %68, %106 : vector<16x64xf32>
    %c0_51 = arith.constant 0 : index
    %c0_52 = arith.constant 0 : index
    %108 = vector.load %arg17[%c0_51, %c0_52] : memref<16x64xf32, #tpu.memory_space<vmem>>, vector<16x64xf32>
    tpu.vector_store %arg17[%c0_51, %c0_52], %107 {strides = array<i32>} : memref<16x64xf32, #tpu.memory_space<vmem>>, vector<16x64xf32>,
    return
  }
  func.func @transform_0(%arg0: i32) -> (i32, i32) {
    %c0_i32 = arith.constant 0 : i32
    %c0_i32_0 = arith.constant 0 : i32
    return %arg0, %c0_i32 : i32, i32
  }
  func.func @transform_1(%arg0: i32) -> (i32, i32) {
    %c0_i32 = arith.constant 0 : i32
    %c0_i32_0 = arith.constant 0 : i32
    %c0_i32_1 = arith.constant 0 : i32
    return %c0_i32, %c0_i32_0 : i32, i32
  }
  func.func @transform_2(%arg0: i32) -> (i32, i32) {
    %c0_i32 = arith.constant 0 : i32
    %c0_i32_0 = arith.constant 0 : i32
    %c0_i32_1 = arith.constant 0 : i32
    return %c0_i32, %c0_i32_0 : i32, i32
  }
  func.func @transform_3(%arg0: i32) -> (i32, i32) {
    %c0_i32 = arith.constant 0 : i32
    %c0_i32_0 = arith.constant 0 : i32
    %c0_i32_1 = arith.constant 0 : i32
    return %c0_i32, %c0_i32_0 : i32, i32
  }
  func.func @transform_4(%arg0: i32) -> (i32, i32) {
    %c0_i32 = arith.constant 0 : i32
    %c0_i32_0 = arith.constant 0 : i32
    %c0_i32_1 = arith.constant 0 : i32
    return %c0_i32, %c0_i32_0 : i32, i32
  }
  func.func @transform_5(%arg0: i32) -> (i32, i32) {
    %c0_i32 = arith.constant 0 : i32
    %c0_i32_0 = arith.constant 0 : i32
    %c0_i32_1 = arith.constant 0 : i32
    return %c0_i32, %c0_i32_0 : i32, i32
  }
  func.func @transform_6(%arg0: i32) -> (i32, i32) {
    %c0_i32 = arith.constant 0 : i32
    %c0_i32_0 = arith.constant 0 : i32
    %c0_i32_1 = arith.constant 0 : i32
    return %c0_i32, %c0_i32_0 : i32, i32
  }
  func.func @transform_7(%arg0: i32) -> (i32, i32) {
    %c0_i32 = arith.constant 0 : i32
    %c0_i32_0 = arith.constant 0 : i32
    %c0_i32_1 = arith.constant 0 : i32
    return %c0_i32, %c0_i32_0 : i32, i32
  }
  func.func @transform_8(%arg0: i32) -> (i32, i32) {
    %c0_i32 = arith.constant 0 : i32
    %c0_i32_0 = arith.constant 0 : i32
    %c0_i32_1 = arith.constant 0 : i32
    return %c0_i32, %c0_i32_0 : i32, i32
  }
  func.func @transform_9(%arg0: i32) -> (i32, i32) {
    %c0_i32 = arith.constant 0 : i32
    %c0_i32_0 = arith.constant 0 : i32
    %c0_i32_1 = arith.constant 0 : i32
    return %c0_i32, %c0_i32_0 : i32, i32
  }
  func.func @transform_10(%arg0: i32) -> (i32, i32) {
    %c0_i32 = arith.constant 0 : i32
    %c0_i32_0 = arith.constant 0 : i32
    %c0_i32_1 = arith.constant 0 : i32
    return %c0_i32, %c0_i32_0 : i32, i32
  }
  func.func @transform_11(%arg0: i32) -> (i32, i32) {
    %c0_i32 = arith.constant 0 : i32
    %c0_i32_0 = arith.constant 0 : i32
    %c0_i32_1 = arith.constant 0 : i32
    return %c0_i32, %c0_i32_0 : i32, i32
  }
  func.func @transform_12(%arg0: i32) -> (i32, i32) {
    %c0_i32 = arith.constant 0 : i32
    %c0_i32_0 = arith.constant 0 : i32
    %c0_i32_1 = arith.constant 0 : i32
    return %c0_i32, %c0_i32_0 : i32, i32
  }
  func.func @transform_13(%arg0: i32) -> (i32, i32) {
    %c0_i32 = arith.constant 0 : i32
    %c0_i32_0 = arith.constant 0 : i32
    %c0_i32_1 = arith.constant 0 : i32
    return %c0_i32, %c0_i32_0 : i32, i32
  }
  func.func @transform_14(%arg0: i32) -> (i32, i32) {
    %c0_i32 = arith.constant 0 : i32
    %c0_i32_0 = arith.constant 0 : i32
    %c0_i32_1 = arith.constant 0 : i32
    return %c0_i32, %c0_i32_0 : i32, i32
  }
  func.func @transform_15(%arg0: i32) -> (i32, i32) {
    %c0_i32 = arith.constant 0 : i32
    %c0_i32_0 = arith.constant 0 : i32
    %c0_i32_1 = arith.constant 0 : i32
    return %c0_i32, %c0_i32_0 : i32, i32
  }
  func.func @transform_16(%arg0: i32) -> (i32, i32) {
    %c0_i32 = arith.constant 0 : i32
    %c0_i32_0 = arith.constant 0 : i32
    return %arg0, %c0_i32 : i32, i32
  }
}

</mosaic_0001>

<bundles_post_ra>
// kernel: tpu_custom_call.1
= control target key start
LH: loop header
LB: loop body
LE: loop exit
PB: predicated region body
PF: predicated region fallthrough
CT: control target
= control target key end

     0   :  { %s2200_s0 = inlined_call_operand.hbm [shape: f32[16,64], index: 0, kind: input, shape index: {}]   ;;  %s2201_s1 = inlined_call_operand.vmem [shape: f32[1,64], index: 1, kind: input, shape index: {}]   ;;  %s2202_s2 = inlined_call_operand.vmem [shape: f32[1,64], index: 2, kind: input, shape index: {}]   ;;  %s2203_s3 = inlined_call_operand.hbm [shape: bf16[64,64], index: 3, kind: input, shape index: {}]   ;;  %s2204_s4 = inlined_call_operand.hbm [shape: bf16[64,64], index: 4, kind: input, shape index: {}]   ;;  %s2205_s5 = inlined_call_operand.hbm [shape: bf16[64,64], index: 5, kind: input, shape index: {}]   ;;  %s2206_s6 = inlined_call_operand.hbm [shape: bf16[64,64], index: 6, kind: input, shape index: {}]   ;;  %s2207_s7 = inlined_call_operand.vmem [shape: f32[1,64], index: 7, kind: input, shape index: {}]   ;;  %s2208_s8 = inlined_call_operand.vmem [shape: f32[1,64], index: 8, kind: input, shape index: {}]   ;;  %s2209_s9 = inlined_call_operand.vmem [shape: f32[1,64], index: 9, kind: input, shape index: {}]   ;;  %s2210_s10 = inlined_call_operand.vmem [shape: bf16[64,256], index: 10, kind: input, shape index: {}]   ;;  %s2211_s11 = inlined_call_operand.vmem [shape: f32[1,256], index: 11, kind: input, shape index: {}]   ;;  %s2212_s12 = inlined_call_operand.vmem [shape: bf16[256,64], index: 12, kind: input, shape index: {}]   ;;  %s2213_s13 = inlined_call_operand.vmem [shape: f32[1,64], index: 13, kind: input, shape index: {}]   ;;  %s2214_s14 = inlined_call_operand.vmem [shape: f32[64,64], index: 14, kind: input, shape index: {}]   ;;  %s2215_s15 = inlined_call_operand.vmem [shape: f32[64,64], index: 15, kind: input, shape index: {}]   ;;  %s2216_s16 = inlined_call_operand.hbm [shape: f32[16,64], index: 16, kind: output, shape index: {}]  }
   0x1   :  { %2221 = sst [smem:[#allocation16_spill]] %s2200_s0 }
   0x2   :  { %2222 = sst [smem:[#allocation17_spill]] %s2216_s16 }
   0x3   :  { %21 = vsyncpa [#allocation3], 0 }
   0x4   :  { %22 = vsyncpa [#allocation6], 0 }
   0x5   :  { %23 = vsyncpa [#allocation9], 0 }
   0x6   :  { %24 = vsyncpa [#allocation4], 0  ;;  %s1670_s21 = smov [#allocation5]   ;;  %s1530_s25 = scalar_lea.hbm %s2203_s3, 512 }
   0x7   :  { %s46_s22 = sshll.u32 %s1670_s21, 4  ;;  %p1531_p0 = scmp.ne.s32.totalorder %s2203_s3, %s1530_s25  ;;  %s47_s22 = int_to_ptr.vmem [resolvable:$true] %s46_s22 }
   0x8   :  { %p1534_p1 = scmp.lt.u32.totalorder %s1530_s25, %s2203_s3 }
   0xa   :  { %p1536_p2 = pnand %p1534_p1, %p1531_p0 }
   0xc   :  { %1539 = shalt.err (!%p1536_p2)
}
   0xd   :  { %s1540_s30 = scalar_lea.vmem %s47_s22, 512  ;;  %p1545_p4 = scmp.lt.s32.totalorder %s47_s22, %s47_s22 }
   0xe   :  { %p1541_p3 = scmp.ne.s32.totalorder %s47_s22, %s1540_s30  ;;  %p1546_p5 = scmp.lt.s32.totalorder %s1540_s30, %s1540_s30 }
  0x10   :  { %p1547_p6 = por %p1546_p5, %p1545_p4 }
  0x12   :  { %p1548_p7 = pnand %p1547_p6, %p1541_p3 }
  0x14   :  { %1551 = shalt.err (!%p1548_p7)
}
  0x15   :  { %s2219_s0 = smov 64   ;;  %s1672_s17 = smov 4  }
  0x16   :  { %52 = dma.hbm_to_vmem [thread:$0]  %s2203_s3, 512, %s47_s22, [#allocation6], %s2219_s0, %s2219_s0, %s1672_s17  }
  0x17   :  { %s1673_s20 = smov [#allocation8]   ;;  %s1674_s23 = smov [#allocation2]  }
  0x18   :  { %s70_s21 = sshll.u32 %s1673_s20, 4  ;;  %s30_s24 = sshll.u32 %s1674_s23, 4  ;;  %s71_s21 = int_to_ptr.vmem [resolvable:$true] %s70_s21  ;;  %s31_s24 = int_to_ptr.vmem [resolvable:$true] %s30_s24 }
  0x19   :  { %s1552_s27 = scalar_lea.hbm %s2205_s5, 512 }
  0x1a   :  { %p1553_p8 = scmp.ne.s32.totalorder %s2205_s5, %s1552_s27  ;;  %p1556_p9 = scmp.lt.u32.totalorder %s1552_s27, %s2205_s5 }
  0x1c   :  { %p1558_p10 = pnand %p1556_p9, %p1553_p8 }
  0x1e   :  { %1561 = shalt.err (!%p1558_p10)
}
  0x1f   :  { %s1562_s3 = scalar_lea.vmem %s71_s21, 512  ;;  %p1567_p12 = scmp.lt.s32.totalorder %s71_s21, %s71_s21 }
  0x20   :  { %p1563_p11 = scmp.ne.s32.totalorder %s71_s21, %s1562_s3  ;;  %p1568_p13 = scmp.lt.s32.totalorder %s1562_s3, %s1562_s3 }
  0x22   :  { %p1569_p0 = por %p1568_p13, %p1567_p12 }
  0x24   :  { %p1570_p1 = pnand %p1569_p0, %p1563_p11 }
  0x26   :  { %1573 = shalt.err (!%p1570_p1)
}
  0x27   :  { %76 = dma.hbm_to_vmem [thread:$0]  %s2205_s5, 512, %s71_s21, [#allocation9], %s2219_s0, %s2219_s0, %s1672_s17  }
  0x28   :  { %s2223_s20 = sld [smem:[#allocation16_spill]] }
  0x2e   :  { %s1574_s23 = scalar_lea.hbm %s2223_s20, 256 }
  0x2f   :  { %p1575_p2 = scmp.ne.s32.totalorder %s2223_s20, %s1574_s23  ;;  %p1578_p3 = scmp.lt.u32.totalorder %s1574_s23, %s2223_s20 }
  0x31   :  { %p1580_p4 = pnand %p1578_p3, %p1575_p2 }
  0x33   :  { %1583 = shalt.err (!%p1580_p4)
}
  0x34   :  { %s1584_s29 = scalar_lea.vmem %s31_s24, 256  ;;  %p1589_p6 = scmp.lt.s32.totalorder %s31_s24, %s31_s24 }
  0x35   :  { %p1585_p5 = scmp.ne.s32.totalorder %s31_s24, %s1584_s29  ;;  %p1590_p7 = scmp.lt.s32.totalorder %s1584_s29, %s1584_s29 }
  0x37   :  { %p1591_p8 = por %p1590_p7, %p1589_p6 }
  0x39   :  { %p1592_p9 = pnand %p1591_p8, %p1585_p5 }
  0x3b   :  { %1595 = shalt.err (!%p1592_p9)
}
  0x3c   :  { %s1675_s5 = smov 128   ;;  %s1676_s21 = smov 8  }
  0x3d   :  { %36 = dma.hbm_to_vmem [thread:$0]  %s2223_s20, 256, %s31_s24, [#allocation3], %s1675_s5, %s1675_s5, %s1676_s21  }
  0x3e   :  { %s1677_s22 = smov [#allocation7]   ;;  %s1678_s19 = smov [#allocation10]  }
  0x3f   :  { %s58_s18 = sshll.u32 %s1677_s22, 4  ;;  %s82_s16 = sshll.u32 %s1678_s19, 4  ;;  %s59_s18 = int_to_ptr.vmem [resolvable:$true] %s58_s18  ;;  %s83_s16 = int_to_ptr.vmem [resolvable:$true] %s82_s16 }
  0x40   :  { %s1596_s26 = scalar_lea.hbm %s2204_s4, 512 }
  0x41   :  { %p1597_p10 = scmp.ne.s32.totalorder %s2204_s4, %s1596_s26  ;;  %p1600_p11 = scmp.lt.u32.totalorder %s1596_s26, %s2204_s4 }
  0x43   :  { %p1602_p12 = pnand %p1600_p11, %p1597_p10 }
  0x45   :  { %1605 = shalt.err (!%p1602_p12)
}
  0x46   :  { %s1606_s24 = scalar_lea.vmem %s59_s18, 512  ;;  %p1611_p0 = scmp.lt.s32.totalorder %s59_s18, %s59_s18 }
  0x47   :  { %p1607_p13 = scmp.ne.s32.totalorder %s59_s18, %s1606_s24  ;;  %p1612_p1 = scmp.lt.s32.totalorder %s1606_s24, %s1606_s24 }
  0x49   :  { %p1613_p2 = por %p1612_p1, %p1611_p0 }
  0x4b   :  { %p1614_p3 = pnand %p1613_p2, %p1607_p13 }
  0x4d   :  { %1617 = shalt.err (!%p1614_p3)
}
  0x4e   :  { %s2224_s20 = smov 64   ;;  %s1618_s19 = scalar_lea.hbm %s2206_s6, 512 }
  0x4f   :  { %64 = dma.hbm_to_vmem [thread:$0]  %s2204_s4, 512, %s59_s18, [#allocation6], %s2224_s20, %s2224_s20, %s1672_s17  }
  0x50   :  { %p1619_p4 = scmp.ne.s32.totalorder %s2206_s6, %s1618_s19  ;;  %p1622_p5 = scmp.lt.u32.totalorder %s1618_s19, %s2206_s6 }
  0x52   :  { %p1624_p6 = pnand %p1622_p5, %p1619_p4 }
  0x54   :  { %1627 = shalt.err (!%p1624_p6)
}
  0x55   :  { %s1628_s28 = scalar_lea.vmem %s83_s16, 512  ;;  %p1633_p8 = scmp.lt.s32.totalorder %s83_s16, %s83_s16 }
  0x56   :  { %p1629_p7 = scmp.ne.s32.totalorder %s83_s16, %s1628_s28  ;;  %p1634_p9 = scmp.lt.s32.totalorder %s1628_s28, %s1628_s28 }
  0x58   :  { %p1635_p10 = por %p1634_p9, %p1633_p8 }
  0x5a   :  { %p1636_p11 = pnand %p1635_p10, %p1629_p7 }
  0x5c   :  { %1639 = shalt.err (!%p1636_p11)
}
  0x5d   :  { %88 = dma.hbm_to_vmem [thread:$0]  %s2206_s6, 512, %s83_s16, [#allocation9], %s2224_s20, %s2224_s20, %s1672_s17  }
  0x5e   :  { %1662 = dma.done.wait [#allocation3], 256  }
  0x5f   :  { %1663 = vsyncadd [#allocation3], 4294967040 }
  0x60   :  { %1664 = dma.done.wait [#allocation6], 1024  }
  0x61   :  { %1665 = vsyncadd [#allocation6], 4294966272 }
  0x62   :  { %1666 = dma.done.wait [#allocation9], 1024  }
  0x63   :  { %1667 = vsyncadd [#allocation9], 4294966272  ;;  %vm127_vm0 = vcmask 523264   ;;  %v1843_v0 = vld [vmem:[#allocation2] sm:$0xff]  ;;  %v1845_v1 = vld [vmem:[#allocation2 + $0x8] sm:$0xff]  ;;  %v1679_v15 = vmov 0.0  }
  0x64   :  { %v128_v2 = vsel %vm127_vm0, %v1843_v0, 0.0  ;;  %v131_v3 = vsel %vm127_vm0, %v1845_v1, 0.0  ;;  %v1470_v14 = vld [vmem:[#allocation5] sm:$0xff]   ;;  %1326 = vmatprep.subr.bf16.mxu1 %v1679_v15  ;;  %1350 = vmatprep.subr.bf16.mxu0 %v1679_v15  ;;  %v1472_v17 = vld [vmem:[#allocation5 + $0x8] sm:$0xff]   ;;  %v1474_v19 = vld [vmem:[#allocation5 + $0x10] sm:$0xff]   ;;  %vm1680_vm1 = vmmov 0  }
  0x65   :  { %129 = vadd.xlane.f32.xlu0 %v128_v2  ;;  %v1471_v16 = vld [vmem:[#allocation8] sm:$0xff]   ;;  %1327 = vmatpush3.bf16.msra.mxu1 %v1470_v14  ;;  %v1473_v18 = vld [vmem:[#allocation8 + $0x8] sm:$0xff]   ;;  %v1475_v20 = vld [vmem:[#allocation8 + $0x10] sm:$0xff]   ;;  %s1682_s18 = smov [#allocation11]  }
  0x66   :  { %1351 = vmatpush3.bf16.msra.mxu0 %v1471_v16  ;;  %1328 = vmatprep.subr.bf16.mxu1 %v1679_v15  ;;  %v1476_v21 = vld [vmem:[#allocation5 + $0x18] sm:$0xff]   ;;  %v1197_v31 = vld [vmem:[%s2201_s1] ss:$0 sm:$0xff]  ;;  %v1478_v39 = vld [vmem:[#allocation7] sm:$0xff]  }
  0x67   :  { %1352 = vmatprep.subr.bf16.mxu0 %v1679_v15  ;;  %v1477_v22 = vld [vmem:[#allocation8 + $0x18] sm:$0xff]   ;;  %1334 = vmatprep.mubr.msk.bf16.mxu1 %vm1680_vm1, %v1679_v15  ;;  %v1198_v35 = vld [vmem:[%s2202_s2] ss:$0 sm:$0xff]  ;;  %v1479_v41 = vld [vmem:[#allocation7 + $0x8] sm:$0xff]  }
  0x68   :  { %1358 = vmatprep.mubr.msk.bf16.mxu0 %vm1680_vm1, %v1679_v15  ;;  %v1480_v42 = vld [vmem:[#allocation7 + $0x10] sm:$0xff]   ;;  %v1481_v43 = vld [vmem:[#allocation7 + $0x18] sm:$0xff]   ;;  %v1907_v54 = vld [vmem:[%s2214_s14 + $0x10] sm:$0xff] }
  0x69   :  { %132 = vadd.xlane.f32.xlu0 %v131_v3  ;;  %1329 = vmatpush3.bf16.msra.mxu1 %v1472_v17  ;;  %v1897_v50 = vld [vmem:[%s2214_s14] sm:$0xff]  ;;  %v1902_v53 = vld [vmem:[%s2214_s14 + $0x8] sm:$0xff]  ;;  %v1915_v56 = vld [vmem:[%s2214_s14 + $0x18] sm:$0xff] }
  0x6a   :  { %1353 = vmatpush3.bf16.msra.mxu0 %v1473_v18  ;;  %1330 = vmatprep.subr.bf16.mxu1 %v1679_v15  ;;  %v1920_v57 = vld [vmem:[%s2214_s14 + $0x20] sm:$0xff]  ;;  %v1925_v58 = vld [vmem:[%s2214_s14 + $0x28] sm:$0xff]  ;;  %v1936_v61 = vld [vmem:[%s2214_s14 + $0x30] sm:$0xff] }
  0x6b   :  { %1354 = vmatprep.subr.bf16.mxu0 %v1679_v15  ;;  %v1941_v62 = vld [vmem:[%s2214_s14 + $0x38] sm:$0xff]  ;;  %s1183_s14 = sshll.u32 %s1682_s18, 4  ;;  %s1184_s14 = int_to_ptr.vmem [resolvable:$true] %s1183_s14 }
  0x6c   :  { %s1640_s6 = scalar_lea.vmem %s1184_s14, 256  ;;  %p1645_p13 = scmp.lt.s32.totalorder %s1184_s14, %s1184_s14 }
  0x6d   :  { %1331 = vmatpush3.bf16.msra.mxu1 %v1474_v19  ;;  %p1641_p12 = scmp.ne.s32.totalorder %s1184_s14, %s1640_s6  ;;  %p1646_p0 = scmp.lt.s32.totalorder %s1640_s6, %s1640_s6 }
  0x6e   :  { %1355 = vmatpush3.bf16.msra.mxu0 %v1475_v20  ;;  %1332 = vmatprep.subr.bf16.mxu1 %v1679_v15 }
  0x6f   :  { %1356 = vmatprep.subr.bf16.mxu0 %v1679_v15  ;;  %p1647_p1 = por %p1646_p0, %p1645_p13 }
  0x71   :  { %1333 = vmatpush3.bf16.msra.mxu1 %v1476_v21  ;;  %p1648_p2 = pnand %p1647_p1, %p1641_p12 }
  0x72   :  { %1357 = vmatpush3.bf16.msra.mxu0 %v1477_v22  ;;  %1338 = vmatprep.subr.bf16.mxu1 %v1679_v15 }
  0x73   :  { %1374 = vmatprep.subr.bf16.mxu0 %v1679_v15 }
  0xf2   :  { %v130_v4 = vpop.xlane.xlu0 %129 }
  0xf3   :  { %v135_v5 = vmul.f32 0.015625, %v130_v4 }
  0xf5   :  { %v137_v6 = vsub.f32 %v1843_v0, %v135_v5 }
  0xf6   :  { %v133_v7 = vpop.xlane.xlu0 %132 }
  0xf7   :  { %v136_v8 = vmul.f32 0.015625, %v133_v7  ;;  %v139_v9 = vmul.f32 %v137_v6, %v137_v6 }
  0xf9   :  { %v138_v10 = vsub.f32 %v1845_v1, %v136_v8  ;;  %v141_v11 = vsel %vm127_vm0, %v139_v9, 0.0 }
  0xfa   :  { %142 = vadd.xlane.f32.xlu1 %v141_v11 }
  0xfb   :  { %v140_v12 = vmul.f32 %v138_v10, %v138_v10 }
  0xfd   :  { %v144_v13 = vsel %vm127_vm0, %v140_v12, 0.0 }
  0xfe   :  { %145 = vadd.xlane.f32.xlu1 %v144_v13 }
 0x187   :  { %v143_v23 = vpop.xlane.xlu1 %142 }
 0x188   :  { %v147_v24 = vmul.f32 0.015625, %v143_v23 }
 0x18a   :  { %v149_v25 = vadd.f32 1e-05, %v147_v24 }
 0x18b   :  { %v146_v26 = vpop.xlane.xlu1 %145 }
 0x18c   :  { %1514 = vrsqrt.f32 %v149_v25  ;;  %v148_v27 = vmul.f32 0.015625, %v146_v26 }
 0x18e   :  { %v150_v28 = vadd.f32 1e-05, %v148_v27 }
 0x190   :  { %1516 = vrsqrt.f32 %v150_v28 }
 0x196   :  { %v1515_v29 = vpop.eup %1514 }
 0x197   :  { %v153_v30 = vmul.f32 %v1515_v29, %v137_v6 }
 0x199   :  { %v161_v34 = vmul.f32 %v1197_v31, %v153_v30 }
 0x19a   :  { %v1517_v32 = vpop.eup %1516 }
 0x19b   :  { %v154_v33 = vmul.f32 %v1517_v32, %v138_v10  ;;  %v169_v37 = vadd.f32 %v1198_v35, %v161_v34 }
 0x19d   :  { %v162_v36 = vmul.f32 %v1197_v31, %v154_v33 }
 0x19f   :  { %v170_v38 = vadd.f32 %v1198_v35, %v162_v36 }
 0x1a1   :  { %v171_v40 = vpack.c.bf16 %v170_v38, %v169_v37 }
 0x1a3   :  { %1335 = vmatmul.mubr.msk.bf16.vlgmr.msra.gmra.mrb[0].mxu1 %vm127_vm0, %v171_v40  ;;  %1359 = vmatmul.mubr.msk.bf16.vlgmr.msra.gmra.mrb[0].mxu0 %vm127_vm0, %v171_v40 }
 0x1a4   :  { %1339 = vmatpush3.bf16.msra.mxu1 %v1478_v39  ;;  %1346 = vmatprep.mubr.msk.bf16.mxu1 %vm1680_vm1, %v1679_v15 }
 0x1a5   :  { %1340 = vmatprep.subr.bf16.mxu1 %v1679_v15  ;;  %1382 = vmatprep.mubr.msk.bf16.mxu0 %vm1680_vm1, %v1679_v15 }
 0x1a8   :  { %1341 = vmatpush3.bf16.msra.mxu1 %v1479_v41 }
 0x1a9   :  { %1342 = vmatprep.subr.bf16.mxu1 %v1679_v15 }
 0x1ac   :  { %1343 = vmatpush3.bf16.msra.mxu1 %v1480_v42 }
 0x1ad   :  { %1344 = vmatprep.subr.bf16.mxu1 %v1679_v15 }
 0x1b0   :  { %1345 = vmatpush3.bf16.msra.mxu1 %v1481_v43 }
 0x1b1   :  { %1362 = vmatprep.subr.bf16.mxu1 %v1679_v15 }
 0x1b3   :  { %1347 = vmatmul.mubr.msk.bf16.vlgmr.msra.gmra.mrb[4].mxu1 %vm127_vm0, %v171_v40 }
 0x1b4   :  { %1370 = vmatprep.mubr.msk.bf16.mxu1 %vm1680_vm1, %v1679_v15 }
 0x276   :  { %v1888_v44 = vpop.f32.mrb[0].mxu1  ;;  %v1890_v45 = vpop.f32.mrb[0].mxu0 }
 0x277   :  { %v1336_v46 = vpop.f32.mrb[1].mxu1  ;;  %v1360_v47 = vpop.f32.mrb[1].mxu0 }
 0x278   :  { %v1892_v48 = vpop.f32.mrb[2].mxu1  ;;  %v390_v49 = vpop.f32.mrb[2].mxu0 }
 0x279   :  { %v1337_v51 = vpop.f32.mrb[3].mxu1  ;;  %v1361_v52 = vpop.f32.mrb[3].mxu0  ;;  %v1910_v55 = vmul.f32 %v1897_v50, %v390_v49  ;;  %v1928_v59 = vmul.f32 %v1902_v53, %v390_v49  ;;  %v1931_v60 = vmul.f32 %v1907_v54, %v390_v49  ;;  %v1944_v63 = vmul.f32 %v1915_v56, %v390_v49 }
 0x27a   :  { %v1947_v2 = vmul.f32 %v1920_v57, %v390_v49  ;;  %v1950_v3 = vmul.f32 %v1925_v58, %v390_v49  ;;  %v1955_v5 = vmul.f32 %v1936_v61, %v390_v49  ;;  %v1958_v6 = vmul.f32 %v1941_v62, %v390_v49 }
 0x27b   :  { %v448_v4 = vpack.c.bf16 %v1928_v59, %v1910_v55  ;;  %v449_v7 = vpack.c.bf16 %v1944_v63, %v1931_v60  ;;  %v428_v51 = vmul.f32 %v1897_v50, %v1890_v45  ;;  %v429_v52 = vmul.f32 %v1902_v53, %v1890_v45 }
 0x27c   :  { %v450_v8 = vpack.c.bf16 %v1950_v3, %v1947_v2  ;;  %v451_v9 = vpack.c.bf16 %v1958_v6, %v1955_v5  ;;  %v1483_v2 = vld [vmem:[#allocation10 + $0x8] sm:$0xff]   ;;  %v1484_v3 = vld [vmem:[#allocation10 + $0x10] sm:$0xff]   ;;  %v1485_v5 = vld [vmem:[#allocation10 + $0x18] sm:$0xff]  }
 0x286   :  { %v314_v10 = vpop.f32.mrb[4].mxu1 }
 0x287   :  { %v1348_v11 = vpop.f32.mrb[5].mxu1  ;;  %v404_v12 = vmul.f32 %v1897_v50, %v314_v10  ;;  %v405_v13 = vmul.f32 %v1902_v53, %v314_v10  ;;  %v406_v22 = vmul.f32 %v1907_v54, %v314_v10  ;;  %v407_v23 = vmul.f32 %v1915_v56, %v314_v10 }
 0x288   :  { %v317_v14 = vpop.f32.mrb[6].mxu1  ;;  %v408_v30 = vmul.f32 %v1920_v57, %v314_v10  ;;  %v409_v31 = vmul.f32 %v1925_v58, %v314_v10  ;;  %v410_v38 = vmul.f32 %v1936_v61, %v314_v10  ;;  %v411_v39 = vmul.f32 %v1941_v62, %v314_v10 }
 0x289   :  { %v1349_v16 = vpop.f32.mrb[7].mxu1  ;;  %v420_v17 = vpack.c.bf16 %v405_v13, %v404_v12  ;;  %v412_v18 = vmul.f32 %v1897_v50, %v317_v14  ;;  %v413_v19 = vmul.f32 %v1902_v53, %v317_v14  ;;  %v414_v25 = vmul.f32 %v1907_v54, %v317_v14 }
 0x28a   :  { %v415_v26 = vmul.f32 %v1915_v56, %v317_v14  ;;  %v421_v27 = vpack.c.bf16 %v407_v23, %v406_v22  ;;  %v416_v33 = vmul.f32 %v1920_v57, %v317_v14  ;;  %v417_v34 = vmul.f32 %v1925_v58, %v317_v14  ;;  %v574_v22 = vld [vmem:[%s2215_s15] sm:$0xff]  ;;  %v575_v23 = vld [vmem:[%s2215_s15 + $0x8] sm:$0xff] }
 0x28b   :  { %v456_v20 = vsel %vm127_vm0, %v420_v17, 0  ;;  %v424_v21 = vpack.c.bf16 %v413_v19, %v412_v18  ;;  %v422_v35 = vpack.c.bf16 %v409_v31, %v408_v30  ;;  %v418_v41 = vmul.f32 %v1936_v61, %v317_v14  ;;  %v580_v31 = vld [vmem:[%s2215_s15 + $0x30] sm:$0xff] }
 0x28c   :  { %1363 = vmatpush3.bf16.xpose.msra.mxu1 %v456_v20  ;;  %v425_v28 = vpack.c.bf16 %v415_v26, %v414_v25  ;;  %v459_v29 = vsel %vm127_vm0, %v421_v27, 0  ;;  %v426_v36 = vpack.c.bf16 %v417_v34, %v416_v33  ;;  %v419_v42 = vmul.f32 %v1941_v62, %v317_v14  ;;  %v576_v25 = vld [vmem:[%s2215_s15 + $0x10] sm:$0xff]  ;;  %v577_v26 = vld [vmem:[%s2215_s15 + $0x18] sm:$0xff] }
 0x28d   :  { %v511_v24 = vsel %vm127_vm0, %v424_v21, 0  ;;  %1364 = vmatprep.subr.bf16.mxu1 %v1679_v15  ;;  %v462_v37 = vsel %vm127_vm0, %v422_v35, 0  ;;  %v423_v43 = vpack.c.bf16 %v411_v39, %v410_v38  ;;  %v394_v10 = vpack.c.bf16 %v1888_v44, %v1888_v44 }
 0x28e   :  { %1375 = vmatpush3.bf16.xpose.msra.mxu0 %v511_v24  ;;  %v514_v32 = vsel %vm127_vm0, %v425_v28, 0  ;;  %v517_v40 = vsel %vm127_vm0, %v426_v36, 0  ;;  %v427_v46 = vpack.c.bf16 %v419_v42, %v418_v41  ;;  %v395_v11 = vpack.c.bf16 %v1892_v48, %v1892_v48  ;;  %v578_v28 = vld [vmem:[%s2215_s15 + $0x20] sm:$0xff] }
 0x28f   :  { %1376 = vmatprep.subr.bf16.mxu0 %v1679_v15  ;;  %v465_v47 = vsel %vm127_vm0, %v423_v43, 0  ;;  %v444_v12 = vpack.c.bf16 %v429_v52, %v428_v51  ;;  %v430_v13 = vmul.f32 %v1907_v54, %v1890_v45  ;;  %v431_v14 = vmul.f32 %v1915_v56, %v1890_v45  ;;  %v1482_v43 = vld [vmem:[#allocation10] sm:$0xff]  }
 0x290   :  { %v520_v49 = vsel %vm127_vm0, %v427_v46, 0  ;;  %v432_v48 = vmul.f32 %v1920_v57, %v1890_v45  ;;  %v433_v50 = vmul.f32 %v1925_v58, %v1890_v45  ;;  %v434_v54 = vmul.f32 %v1936_v61, %v1890_v45 }
 0x291   :  { %v445_v44 = vpack.c.bf16 %v431_v14, %v430_v13  ;;  %v435_v56 = vmul.f32 %v1941_v62, %v1890_v45  ;;  %v1441_v24 = vpack.c.bf16 %v575_v23, %v574_v22  ;;  %v1445_v27 = vpack.c.bf16 %v577_v26, %v576_v25  ;;  %v1491_v22 = vld [vmem:[%s2210_s10 + $0x14] ss:$8 sps:$4 sm:$0xff]   ;;  %v1489_v23 = vld [vmem:[%s2210_s10 + $0x10] ss:$8 sps:$4 sm:$0xff]   ;;  %v1494_v25 = vld [vmem:[%s2210_s10 + $0x24] ss:$8 sps:$4 sm:$0xff]  }
 0x292   :  { %v446_v53 = vpack.c.bf16 %v433_v50, %v432_v48  ;;  %v1497_v26 = vld [vmem:[%s2210_s10 + $0x34] ss:$8 sps:$4 sm:$0xff]  }
 0x293   :  { %v447_v16 = vpack.c.bf16 %v435_v56, %v434_v54 }
 0x294   :  { %1365 = vmatpush3.bf16.xpose.msra.mxu1 %v459_v29  ;;  %v579_v29 = vld [vmem:[%s2215_s15 + $0x28] sm:$0xff] }
 0x295   :  { %1366 = vmatprep.subr.bf16.mxu1 %v1679_v15  ;;  %v1449_v30 = vpack.c.bf16 %v579_v29, %v578_v28  ;;  %v1495_v28 = vld [vmem:[%s2210_s10 + $0x30] ss:$8 sps:$4 sm:$0xff]   ;;  %v1498_v29 = vld [vmem:[%s2212_s12 + $0x40] sm:$0xff]  }
 0x296   :  { %1377 = vmatpush3.bf16.xpose.msra.mxu0 %v514_v32  ;;  %v581_v32 = vld [vmem:[%s2215_s15 + $0x38] sm:$0xff] }
 0x297   :  { %1378 = vmatprep.subr.bf16.mxu0 %v1679_v15  ;;  %v1453_v33 = vpack.c.bf16 %v581_v32, %v580_v31  ;;  %v1500_v31 = vld [vmem:[%s2212_s12 + $0x48] sm:$0xff]  }
 0x298   :  { %v1501_v32 = vld [vmem:[%s2212_s12 + $0x8] sm:$0xff]  }
 0x29c   :  { %1367 = vmatpush3.bf16.xpose.msra.mxu1 %v462_v37 }
 0x29d   :  { %1368 = vmatprep.subr.bf16.mxu1 %v1679_v15 }
 0x29e   :  { %1379 = vmatpush3.bf16.xpose.msra.mxu0 %v517_v40 }
 0x29f   :  { %1380 = vmatprep.subr.bf16.mxu0 %v1679_v15 }
 0x2a4   :  { %1369 = vmatpush3.bf16.xpose.msra.mxu1 %v465_v47 }
 0x2a5   :  { %1442 = vmatprep.subr.bf16.mxu1 %v1441_v24 }
 0x2a6   :  { %1381 = vmatpush3.bf16.xpose.msra.mxu0 %v520_v49 }
 0x2a7   :  { %1405 = vmatprep.subr.bf16.mxu0 %v1679_v15 }
 0x2ab   :  { %1371 = vmatmul.mubr.msk.bf16.vlgmr.msra.gmra.mrb[8].mxu1 %vm127_vm0, %v394_v10 }
 0x2ac   :  { %1444 = vmatpush3.bf16.msra.mxu1 %v1441_v24  ;;  %v1492_v24 = vld [vmem:[%s2210_s10 + $0x20] ss:$8 sps:$4 sm:$0xff]  }
 0x2ad   :  { %1383 = vmatmul.mubr.msk.bf16.vlgmr.msra.gmra.mrb[4].mxu0 %vm127_vm0, %v395_v11  ;;  %1446 = vmatprep.subr.bf16.mxu1 %v1445_v27 }
 0x2ae   :  { %1406 = vmatpush3.bf16.msra.mxu0 %v444_v12  ;;  %1413 = vmatprep.mubr.msk.bf16.mxu0 %vm1680_vm1, %v1679_v15  ;;  %v1220_v12 = vld [vmem:[%s2207_s7] ss:$0 sm:$0xff] }
 0x2af   :  { %1407 = vmatprep.subr.bf16.mxu0 %v1679_v15 }
 0x2b0   :  { %1448 = vmatpush3.bf16.msra.mxu1 %v1445_v27  ;;  %v1681_v27 = vmov 0  }
 0x2b1   :  { %1450 = vmatprep.subr.bf16.mxu1 %v1449_v30 }
 0x2b2   :  { %1408 = vmatpush3.bf16.msra.mxu0 %v445_v44 }
 0x2b3   :  { %1409 = vmatprep.subr.bf16.mxu0 %v1679_v15 }
 0x2b4   :  { %1452 = vmatpush3.bf16.msra.mxu1 %v1449_v30  ;;  %v1499_v30 = vld [vmem:[%s2212_s12] sm:$0xff]  }
 0x2b5   :  { %1454 = vmatprep.subr.bf16.mxu1 %v1453_v33 }
 0x2b6   :  { %1410 = vmatpush3.bf16.msra.mxu0 %v446_v53 }
 0x2b7   :  { %1411 = vmatprep.subr.bf16.mxu0 %v1679_v15 }
 0x2b8   :  { %1456 = vmatpush3.bf16.msra.mxu1 %v1453_v33  ;;  %v1502_v33 = vld [vmem:[%s2212_s12 + $0x50] sm:$0xff]  }
 0x2b9   :  { %1417 = vmatprep.subr.bf16.mxu1 %v1679_v15 }
 0x2ba   :  { %1412 = vmatpush3.bf16.msra.mxu0 %v447_v16 }
 0x2bb   :  { %1429 = vmatprep.subr.bf16.mxu0 %v1679_v15 }
 0x37e   :  { %v501_v57 = vpop.f32.mrb[8].mxu1 }
 0x37f   :  { %v1372_v17 = vpop.f32.mrb[9].mxu1  ;;  %v562_v58 = vsel %vm127_vm0, %v501_v57, -inf }
 0x380   :  { %v556_v18 = vpop.f32.mrb[4].mxu0  ;;  %563 = vmax.xlane.f32.xlu0 %v562_v58  ;;  %v504_v19 = vpop.f32.mrb[10].mxu1 }
 0x381   :  { %v1373_v20 = vpop.f32.mrb[11].mxu1  ;;  %v1384_v21 = vpop.f32.mrb[5].mxu0  ;;  %v565_v61 = vsel %vm127_vm0, %v556_v18, -inf }
 0x382   :  { %566 = vmax.xlane.f32.xlu1 %v565_v61  ;;  %v559_v45 = vpop.f32.mrb[6].mxu0 }
 0x383   :  { %v1385_v62 = vpop.f32.mrb[7].mxu0  ;;  %v1488_v45 = vld [vmem:[%s2210_s10 + $0x4] ss:$8 sps:$4 sm:$0xff]  }
 0x384   :  { %v1486_v62 = vld [vmem:[%s2210_s10] ss:$8 sps:$4 sm:$0xff]  }
 0x40d   :  { %v564_v34 = vpop.xlane.xlu0 %563 }
 0x40e   :  { %v568_v35 = vsub.f32 %v501_v57, %v564_v34  ;;  %v1503_v34 = vld [vmem:[%s2212_s12 + $0x10] sm:$0xff]  }
 0x40f   :  { %v567_v36 = vpop.xlane.xlu1 %566 }
 0x410   :  { %v570_v37 = vmul.f32 1.442695, %v568_v35  ;;  %v569_v38 = vsub.f32 %v556_v18, %v567_v36  ;;  %v1504_v35 = vld [vmem:[%s2212_s12 + $0x58] sm:$0xff]  }
 0x411   :  { %v1505_v36 = vld [vmem:[%s2212_s12 + $0x18] sm:$0xff]  }
 0x412   :  { %1518 = vpow2.f32 %v570_v37  ;;  %v572_v39 = vmul.f32 1.442695, %v569_v38  ;;  %v1506_v37 = vld [vmem:[%s2212_s12 + $0x60] sm:$0xff]  }
 0x413   :  { %v1507_v38 = vld [vmem:[%s2212_s12 + $0x20] sm:$0xff]  }
 0x414   :  { %1520 = vpow2.f32 %v572_v39  ;;  %v1508_v39 = vld [vmem:[%s2212_s12 + $0x68] sm:$0xff]  }
 0x41c   :  { %v1519_v40 = vpop.eup %1518 }
 0x41d   :  { %1402 = vmatprep.mubr.msk.f32.mxu1 %vm127_vm0, %v1519_v40 }
 0x41e   :  { %v1521_v41 = vpop.eup %1520 }
 0x41f   :  { %1403 = vmatmul.mubr.msk.f32.vlgmr.msra.gmra.mrb[12].mxu1 %vm127_vm0, %v1521_v41 }
 0x420   :  { %1418 = vmatpush3.bf16.msra.mxu1 %v448_v4  ;;  %1425 = vmatprep.mubr.msk.bf16.mxu1 %vm1680_vm1, %v1679_v15 }
 0x421   :  { %1419 = vmatprep.subr.bf16.mxu1 %v1679_v15 }
 0x424   :  { %1420 = vmatpush3.bf16.msra.mxu1 %v449_v7 }
 0x425   :  { %1421 = vmatprep.subr.bf16.mxu1 %v1679_v15 }
 0x428   :  { %1422 = vmatpush3.bf16.msra.mxu1 %v450_v8 }
 0x429   :  { %1423 = vmatprep.subr.bf16.mxu1 %v1679_v15 }
 0x42c   :  { %1424 = vmatpush3.bf16.msra.mxu1 %v451_v9 }
 0x42d   :  { %949 = vmatprep.subr.bf16.mxu1 %v1488_v45 }
 0x4f2   :  { %v1404_v55 = vpop.f32.mrb[12].mxu1 }
 0x4f3   :  { %1522 = vrcp.f32 %v1404_v55  ;;  %v654_v59 = vpop.f32.mrb[13].mxu1 }
 0x4f4   :  { %1524 = vrcp.f32 %v654_v59 }
 0x4fd   :  { %v1523_v4 = vpop.eup %1522 }
 0x4fe   :  { %v1525_v42 = vpop.eup %1524  ;;  %v666_v60 = vmul.f32 %v1523_v4, %v1521_v41 }
 0x4ff   :  { %v665_v63 = vmul.f32 %v1525_v42, %v1519_v40 }
 0x500   :  { %v668_v7 = vpack.c.bf16 %v666_v60, %v666_v60 }
 0x501   :  { %v667_v46 = vpack.c.bf16 %v665_v63, %v665_v63  ;;  %v1226_v63 = vld [vmem:[%s2208_s8] ss:$0 sm:$0xff] }
 0x502   :  { %1426 = vmatmul.mubr.msk.bf16.vlgmr.msra.gmra.mrb[16].mxu1 %vm127_vm0, %v668_v7 }
 0x503   :  { %1414 = vmatmul.mubr.msk.bf16.vlgmr.msra.gmra.mrb[8].mxu0 %vm127_vm0, %v667_v46  ;;  %950 = vmatpush1.bf16.msra.mxu1 %v1486_v62 }
 0x504   :  { %1430 = vmatpush3.bf16.msra.mxu0 %v1482_v43  ;;  %1437 = vmatprep.mubr.msk.bf16.mxu0 %vm1680_vm1, %v1679_v15 }
 0x505   :  { %1431 = vmatprep.subr.bf16.mxu0 %v1679_v15  ;;  %951 = vmatprep.subr.bf16.mxu1 %v1491_v22  ;;  %v1237_v22 = vld [vmem:[%s2213_s13] ss:$0 sm:$0xff] }
 0x506   :  { %981 = vmatprep.mubr.bf16.mxu1 %v1681_v27 }
 0x507   :  { %952 = vmatpush1.bf16.msra.mxu1 %v1489_v23 }
 0x508   :  { %1432 = vmatpush3.bf16.msra.mxu0 %v1483_v2  ;;  %953 = vmatprep.subr.bf16.mxu1 %v1494_v25 }
 0x509   :  { %1433 = vmatprep.subr.bf16.mxu0 %v1679_v15 }
 0x50b   :  { %954 = vmatpush1.bf16.msra.mxu1 %v1492_v24 }
 0x50c   :  { %1434 = vmatpush3.bf16.msra.mxu0 %v1484_v3  ;;  %955 = vmatprep.subr.bf16.mxu1 %v1497_v26  ;;  %v1227_v3 = vld [vmem:[%s2209_s9] ss:$0 sm:$0xff] }
 0x50d   :  { %1435 = vmatprep.subr.bf16.mxu0 %v1679_v15 }
 0x50f   :  { %956 = vmatpush1.bf16.msra.mxu1 %v1495_v28 }
 0x510   :  { %1436 = vmatpush3.bf16.msra.mxu0 %v1485_v5 }
 0x511   :  { %1304 = vmatprep.subr.bf16.mxu0 %v1498_v29 }
 0x5d5   :  { %v749_v6 = vpop.f32.mrb[16].mxu1 }
 0x5d6   :  { %v706_v8 = vpop.f32.mrb[8].mxu0  ;;  %v1427_v9 = vpop.f32.mrb[17].mxu1 }
 0x5d7   :  { %v755_v47 = vpack.c.bf16 %v749_v6, %v706_v8  ;;  %v1415_v49 = vpop.f32.mrb[9].mxu0  ;;  %v752_v51 = vpop.f32.mrb[18].mxu1 }
 0x5d8   :  { %v709_v52 = vpop.f32.mrb[10].mxu0  ;;  %v1428_v10 = vpop.f32.mrb[19].mxu1  ;;  %v1510_v49 = vld [vmem:[%s2212_s12 + $0x70] sm:$0xff]  }
 0x5d9   :  { %v1416_v11 = vpop.f32.mrb[11].mxu0  ;;  %1438 = vmatmul.mubr.msk.bf16.vlgmr.msra.gmra.mrb[12].mxu0 %vm127_vm0, %v755_v47  ;;  %v1509_v47 = vld [vmem:[%s2212_s12 + $0x28] sm:$0xff]   ;;  %v1511_v51 = vld [vmem:[%s2212_s12 + $0x30] sm:$0xff]   ;;  %v1512_v52 = vld [vmem:[%s2212_s12 + $0x78] sm:$0xff]  }
 0x5da   :  { %1305 = vmatpush3.bf16.msra.mxu0 %v1499_v30  ;;  %v1513_v10 = vld [vmem:[%s2212_s12 + $0x38] sm:$0xff]   ;;  %v896_v11 = vlaneseq }
 0x5db   :  { %1306 = vmatprep.subr.bf16.mxu0 %v1500_v31 }
 0x5de   :  { %1307 = vmatpush3.bf16.msra.mxu0 %v1501_v32 }
 0x5df   :  { %1308 = vmatprep.subr.bf16.mxu0 %v1502_v33 }
 0x5e2   :  { %1309 = vmatpush3.bf16.msra.mxu0 %v1503_v34 }
 0x5e3   :  { %1310 = vmatprep.subr.bf16.mxu0 %v1504_v35 }
 0x5e6   :  { %1311 = vmatpush3.bf16.msra.mxu0 %v1505_v36 }
 0x5e7   :  { %1312 = vmatprep.subr.bf16.mxu0 %v1506_v37 }
 0x5ea   :  { %1313 = vmatpush3.bf16.msra.mxu0 %v1507_v38 }
 0x5eb   :  { %1314 = vmatprep.subr.bf16.mxu0 %v1508_v39 }
 0x5ee   :  { %1315 = vmatpush3.bf16.msra.mxu0 %v1509_v47 }
 0x5ef   :  { %1316 = vmatprep.subr.bf16.mxu0 %v1510_v49 }
 0x5f2   :  { %1317 = vmatpush3.bf16.msra.mxu0 %v1511_v51 }
 0x5f3   :  { %1318 = vmatprep.subr.bf16.mxu0 %v1512_v52 }
 0x5f6   :  { %1319 = vmatpush3.bf16.msra.mxu0 %v1513_v10 }
 0x6ac   :  { %v832_v13 = vpop.f32.mrb[12].mxu0 }
 0x6ad   :  { %v833_v14 = vadd.f32 %v1220_v12, %v832_v13  ;;  %v1439_v15 = vpop.f32.mrb[13].mxu0 }
 0x6ae   :  { %v835_v44 = vpop.f32.mrb[14].mxu0 }
 0x6af   :  { %v2083_v48 = vadd.f32 %v833_v14, %v1843_v0  ;;  %v836_v50 = vadd.f32 %v1220_v12, %v835_v44  ;;  %v1440_v53 = vpop.f32.mrb[15].mxu0  ;;  %v897_v12 = vshrl.u32 %v896_v11, 7  ;;  %v894_v14 = vld [vmem:[%s2211_s11] sm:$0x3] }
 0x6b1   :  { %v2086_v54 = vadd.f32 %v836_v50, %v1845_v1  ;;  %v843_v56 = vsel %vm127_vm0, %v2083_v48, 0.0  ;;  %v898_v13 = vsub.s32 0, %v897_v12  ;;  %v902_v15 = vsub.s32 1, %v897_v12 }
 0x6b2   :  { %844 = vadd.xlane.f32.xlu0 %v843_v56 }
 0x6b3   :  { %v846_v16 = vsel %vm127_vm0, %v2086_v54, 0.0  ;;  %v899_v44 = vrot.slane %v894_v14, %v898_v13  ;;  %v903_v50 = vrot.slane %v894_v14, %v902_v15 }
 0x6b4   :  { %847 = vadd.xlane.f32.xlu1 %v846_v16 }
 0x73f   :  { %v845_v57 = vpop.xlane.xlu0 %844 }
 0x740   :  { %v849_v17 = vmul.f32 0.015625, %v845_v57 }
 0x741   :  { %v848_v58 = vpop.xlane.xlu1 %847 }
 0x742   :  { %v851_v18 = vsub.f32 %v2083_v48, %v849_v17  ;;  %v850_v0 = vmul.f32 0.015625, %v848_v58 }
 0x744   :  { %v852_v19 = vsub.f32 %v2086_v54, %v850_v0  ;;  %v853_v20 = vmul.f32 %v851_v18, %v851_v18 }
 0x746   :  { %v855_v1 = vsel %vm127_vm0, %v853_v20, 0.0  ;;  %v854_v21 = vmul.f32 %v852_v19, %v852_v19 }
 0x747   :  { %856 = vadd.xlane.f32.xlu0 %v855_v1 }
 0x748   :  { %v858_v61 = vsel %vm127_vm0, %v854_v21, 0.0 }
 0x749   :  { %859 = vadd.xlane.f32.xlu1 %v858_v61 }
 0x7d4   :  { %v857_v40 = vpop.xlane.xlu0 %856 }
 0x7d5   :  { %v861_v41 = vmul.f32 0.015625, %v857_v40 }
 0x7d6   :  { %v860_v55 = vpop.xlane.xlu1 %859 }
 0x7d7   :  { %v863_v59 = vadd.f32 1e-05, %v861_v41  ;;  %v862_v4 = vmul.f32 0.015625, %v860_v55 }
 0x7d9   :  { %1526 = vrsqrt.f32 %v863_v59  ;;  %v864_v42 = vadd.f32 1e-05, %v862_v4 }
 0x7db   :  { %1528 = vrsqrt.f32 %v864_v42 }
 0x7e3   :  { %v1527_v60 = vpop.eup %1526 }
 0x7e4   :  { %v867_v7 = vmul.f32 %v1527_v60, %v851_v18 }
 0x7e5   :  { %v1529_v43 = vpop.eup %1528 }
 0x7e6   :  { %v875_v46 = vmul.f32 %v1226_v63, %v867_v7  ;;  %v868_v2 = vmul.f32 %v1529_v43, %v852_v19 }
 0x7e8   :  { %v876_v5 = vmul.f32 %v1226_v63, %v868_v2  ;;  %v883_v6 = vadd.f32 %v1227_v3, %v875_v46 }
 0x7ea   :  { %v884_v8 = vadd.f32 %v1227_v3, %v876_v5 }
 0x7ec   :  { %v885_v9 = vpack.c.bf16 %v884_v8, %v883_v6 }
 0x7ee   :  { %1236 = vmatmul.mubr.msk.bf16.vlgmr.msra.gmra.mrb[20].mxu1 %vm127_vm0, %v885_v9 }
 0x8c1   :  { %v983_v53 = vpop.f32.mrb[20].mxu1 }
 0x8c2   :  { %v984_v56 = vadd.f32 %v983_v53, %v899_v44  ;;  %v985_v16 = vpop.f32.mrb[21].mxu1 }
 0x8c3   :  { %v986_v57 = vadd.f32 %v985_v16, %v903_v50  ;;  %v987_v17 = vpop.f32.mrb[22].mxu1 }
 0x8c4   :  { %v988_v58 = vadd.f32 %v987_v17, %v899_v44  ;;  %v989_v18 = vpop.f32.mrb[23].mxu1  ;;  %v992_v19 = vmax.f32 %v984_v56, 0.0 }
 0x8c5   :  { %v990_v0 = vadd.f32 %v989_v18, %v903_v50  ;;  %v993_v1 = vmax.f32 %v986_v57, 0.0 }
 0x8c6   :  { %v994_v20 = vmax.f32 %v988_v58, 0.0 }
 0x8c7   :  { %v995_v21 = vmax.f32 %v990_v0, 0.0 }
 0x8c8   :  { %v996_v61 = vpack.c.bf16 %v994_v20, %v992_v19 }
 0x8c9   :  { %v997_v45 = vpack.c.bf16 %v995_v21, %v993_v1 }
 0x8cb   :  { %1165 = vmatprep.mubr.bf16.mxu0 %v997_v45 }
 0x8cc   :  { %1166 = vmatmul.mubr.bf16.vlgmr.msra.gmra.mrb[16].mxu0 %v996_v61 }
 0x99f   :  { %v1320_v62 = vpop.f32.mrb[16].mxu0 }
 0x9a0   :  { %v1321_v23 = vpop.f32.mrb[17].mxu0 }
 0x9a1   :  { %v1322_v24 = vadd.f32 %v1321_v23, %v1320_v62  ;;  %v1323_v25 = vpop.f32.mrb[18].mxu0 }
 0x9a2   :  { %v1324_v26 = vpop.f32.mrb[19].mxu0 }
 0x9a3   :  { %v1168_v27 = vadd.f32 %v1322_v24, %v1237_v22  ;;  %v1325_v28 = vadd.f32 %v1324_v26, %v1323_v25 }
 0x9a5   :  { %v1174_v29 = vadd.f32 %v1168_v27, %v2083_v48  ;;  %v1171_v30 = vadd.f32 %v1325_v28, %v1237_v22 }
 0x9a7   :  { %1176 = vst.msk [vmem:[#allocation11] sm:$0xff] %vm127_vm0, %v1174_v29  ;;  %v1175_v31 = vadd.f32 %v1171_v30, %v2086_v54 }
 0x9a9   :  { %1177 = vst.msk [vmem:[#allocation11 + $0x8] sm:$0xff] %vm127_vm0, %v1175_v31 }
 0x9aa   :  { %1651 = shalt.err (!%p1648_p2)
}
 0x9ab   :  { %s2225_s16 = sld [smem:[#allocation17_spill]] }
 0x9b1   :  { %s1652_s29 = scalar_lea.hbm %s2225_s16, 256 }
 0x9b2   :  { %p1653_p3 = scmp.ne.s32.totalorder %s2225_s16, %s1652_s29  ;;  %p1656_p4 = scmp.lt.u32.totalorder %s1652_s29, %s2225_s16 }
 0x9b4   :  { %p1658_p5 = pnand %p1656_p4, %p1653_p3 }
 0x9b6   :  { %1661 = shalt.err (!%p1658_p5)
}
 0x9b7   :  { %1189 = dma.vmem_to_hbm [thread:$0]  %s1184_s14, 256, %s2225_s16, [#allocation4], %s1675_s5, %s1675_s5, %s1676_s21  }
 0x9b8   :  { %1668 = dma.done.wait [#allocation4], 256  }
 0x9b9   :  { %1669 = vsyncadd [#allocation4], 4294967040 }
 0x9ba   :  { %1193 = vsyncpa [#allocation3], 1 }
 0x9bb   :  { %1194 = vsyncpa [#allocation6], 1 }
 0x9bc   :  { %1195 = vsyncpa [#allocation9], 1 }
 0x9bd   :  { %1196 = vsyncpa [#allocation4], 1 }

</bundles_post_ra>
